<compile_context>
chip_gen: v7x
topology: tpu7x:2x2x1
jax: 0.10.0
libtpu: 0.0.40
codegen_flags: <defaults>
</compile_context>

<pallas_src>
import math
import functools

import jax
import jax.numpy as jnp
from jax.experimental import pallas as pl
from jax.experimental.pallas import tpu as pltpu

# Table sizes from the PyTorch module's __init__ (only used by the reference).
WEEKDAY_SIZE = 7
DAY_SIZE = 32
MONTH_SIZE = 13
YEAR_SIZE = 2040

NUM_FIELDS = 4  # year, month, day, weekday


def _round_up(n: int, m: int) -> int:
    return ((n + m - 1) // m) * m


def fixed_embedding_table(c_in: int, d_model: int) -> jnp.ndarray:
    """Deterministic sinusoidal table, identical to FixedEmbedding.__init__."""
    position = jnp.arange(c_in, dtype=jnp.float32)[:, None]                    # (c_in, 1)
    div_term = jnp.exp(
        jnp.arange(0, d_model, 2, dtype=jnp.float32) * -(math.log(10000.0) / d_model)
    )                                                                          # (D/2,)
    w = jnp.zeros((c_in, d_model), jnp.float32)
    w = w.at[:, 0::2].set(jnp.sin(position * div_term))
    w = w.at[:, 1::2].set(jnp.cos(position * div_term))
    return w


def _temporal_emb_kernel(x_ref, fo_ref, o_ref):
    # x_ref:  (TILE, 4) int32   -- flattened temporal marks for TILE positions
    # fo_ref: (2, D)    float32 -- row 0: freq, freq[2i] = freq[2i+1] = div_term[i]
    #                              row 1: offset, 0 on even lanes, pi/2 on odd lanes
    # o_ref:  (TILE, D) float32
    idx = x_ref[...].astype(jnp.float32)                 # (TILE, 4)
    freq = fo_ref[0:1, :]                                 # (1, D)
    off = fo_ref[1:2, :]                                  # (1, D)

    # sin(phase) on even lanes, cos(phase) = sin(phase + pi/2) on odd lanes.
    acc = jnp.sin(idx[:, 0:1] * freq + off)               # (TILE, D), EUP
    for f in range(1, NUM_FIELDS):                         # static unroll
        acc = acc + jnp.sin(idx[:, f:f + 1] * freq + off)
    o_ref[...] = acc.astype(o_ref.dtype)


def _choose_tile(n_rows: int, d_model: int, row_tile: int) -> int:
    """Pick a row tile: fat enough to amortize grid overhead, small enough for
    VMEM, and small enough that the parallel grid axis has >= 2 steps (v7x)."""
    # Keep each output buffer (double-buffered by the pipeline) around <= 4 MiB.
    vmem_cap_rows = max(8, (4 * 1024 * 1024) // (d_model * 4))
    vmem_cap_rows = max(8, (vmem_cap_rows // 8) * 8)
    tile = min(row_tile, vmem_cap_rows)
    # Prefer at least 2 grid steps so both v7x TensorCores get work.
    two_step_rows = _round_up(max(-(-n_rows // 2), 8), 8)
    tile = min(tile, two_step_rows)
    return max(8, (tile // 8) * 8)


@functools.partial(jax.jit, static_argnames=("d_model", "row_tile"))
def temporal_embedding(x, *, d_model, row_tile=1024):
    """x: (B, S, 4) integer marks -> (B, S, d_model) float32."""
    assert d_model % 2 == 0, "d_model must be even (as in the PyTorch module)"
    x = x.astype(jnp.int32)
    B, S, F = x.shape
    assert F == NUM_FIELDS, "expected 4 temporal fields (year, month, day, weekday)"

    # Flatten (B, S) -> N rows, pad to a multiple of the row tile.
    N = B * S
    tile = _choose_tile(N, d_model, row_tile)
    n_pad = _round_up(N, tile)
    x_flat = x.reshape(N, F)
    if n_pad != N:
        x_flat = jnp.pad(x_flat, ((0, n_pad - N), (0, 0)))

    # Per-lane frequency + phase offset (same div_term as FixedEmbedding,
    # computed on the host so there is no in-kernel exp / iota / select).
    div_term = jnp.exp(
        jnp.arange(0, d_model, 2, dtype=jnp.float32) * -(math.log(10000.0) / d_model)
    )
    freq = jnp.repeat(div_term, 2)[:d_model]                                   # (D,)
    offset = jnp.tile(jnp.array([0.0, math.pi / 2.0], jnp.float32), d_model // 2)
    freq_off = jnp.stack([freq, offset], axis=0)                               # (2, D)

    out = pl.pallas_call(
        _temporal_emb_kernel,
        out_shape=jax.ShapeDtypeStruct((n_pad, d_model), jnp.float32),
        grid_spec=pltpu.PrefetchScalarGridSpec(
            num_scalar_prefetch=0,
            grid=(n_pad // tile,),
            in_specs=[
                pl.BlockSpec((tile, NUM_FIELDS), lambda i: (i, 0)),
                pl.BlockSpec((2, d_model), lambda i: (0, 0)),
            ],
            out_specs=pl.BlockSpec((tile, d_model), lambda i: (i, 0)),
        ),
        compiler_params=pltpu.CompilerParams(
            dimension_semantics=("parallel",),
        ),
    )(x_flat, freq_off)

    return out[:N].reshape(B, S, d_model)


def temporal_embedding_ref(x, year_w, month_w, day_w, week_w):
    """Pure-JAX reference matching the PyTorch forward (table gathers)."""
    x = x.astype(jnp.int32)
    return (jnp.take(year_w, x[:, :, 0], axis=0)
            + jnp.take(month_w, x[:, :, 1], axis=0)
            + jnp.take(day_w, x[:, :, 2], axis=0)
            + jnp.take(week_w, x[:, :, 3], axis=0))


if __name__ == "__main__":
    B, S, D = 2, 8, 32

    # Deterministic fixed embedding tables (embed_type='fixed') for the reference.
    year_w = fixed_embedding_table(YEAR_SIZE, D)
    month_w = fixed_embedding_table(MONTH_SIZE, D)
    day_w = fixed_embedding_table(DAY_SIZE, D)
    week_w = fixed_embedding_table(WEEKDAY_SIZE, D)

    # Deterministic example temporal marks.
    key = jax.random.PRNGKey(0)
    k0, k1, k2, k3 = jax.random.split(key, 4)
    year_idx = jax.random.randint(k0, (B, S, 1), 0, YEAR_SIZE, dtype=jnp.int32)
    month_idx = jax.random.randint(k1, (B, S, 1), 0, MONTH_SIZE, dtype=jnp.int32)
    day_idx = jax.random.randint(k2, (B, S, 1), 0, DAY_SIZE, dtype=jnp.int32)
    week_idx = jax.random.randint(k3, (B, S, 1), 0, WEEKDAY_SIZE, dtype=jnp.int32)
    x = jnp.concatenate([year_idx, month_idx, day_idx, week_idx], axis=-1)  # (B, S, 4)

    out = temporal_embedding(x, d_model=D)
    out = jax.block_until_ready(out)

    ref = temporal_embedding_ref(x, year_w, month_w, day_w, week_w)
    assert out.shape == (B, S, D)
    # Odd lanes use sin(phase + pi/2) instead of cos(phase); for year phases up to
    # ~2039 rad the f32 rounding of (phase + pi/2) adds up to ~6e-5 argument error,
    # so compare at 2e-4 (still far below any meaningful tolerance for f32 sinusoids).
    assert jnp.allclose(out, ref, atol=2e-4, rtol=2e-4), "mismatch vs reference"

    print("KERNEL_OK")
</pallas_src>

<mosaic_0001>
module attributes {stable_mosaic.version = 11 : i64} {
  func.func @_temporal_emb_kernel(%arg0: i32, %arg1: memref<8x4xi32, #tpu.memory_space<vmem>>, %arg2: memref<2x32xf32, #tpu.memory_space<vmem>>, %arg3: memref<8x32xf32, #tpu.memory_space<vmem>>) attributes {dimension_semantics = [#tpu.dimension_semantics<parallel>], iteration_bounds = array<i64: 2>, scalar_prefetch = 0 : i64, scratch_operands = 0 : i64, tpu.core_type = #tpu.core_type<tc>, window_params = [{transform_indices = @transform_0, window_bounds = array<i64: 8, 4>}, {pipeline_mode = #tpu.pipeline_mode<synchronous>, transform_indices = @transform_1, window_bounds = array<i64: 2, 32>}, {transform_indices = @transform_2, window_bounds = array<i64: 8, 32>}]} {
    %c0 = arith.constant 0 : index
    %c0_0 = arith.constant 0 : index
    %0 = vector.load %arg1[%c0, %c0_0] : memref<8x4xi32, #tpu.memory_space<vmem>>, vector<8x4xi32>
    %1 = arith.sitofp %0 : vector<8x4xi32> to vector<8x4xf32>
    %c0_1 = arith.constant 0 : index
    %c0_2 = arith.constant 0 : index
    %2 = vector.load %arg2[%c0_1, %c0_2] : memref<2x32xf32, #tpu.memory_space<vmem>>, vector<1x32xf32>
    %c1 = arith.constant 1 : index
    %c0_3 = arith.constant 0 : index
    %3 = vector.load %arg2[%c1, %c0_3] : memref<2x32xf32, #tpu.memory_space<vmem>>, vector<1x32xf32>
    %4 = vector.extract_strided_slice %1 {offsets = [0, 0], sizes = [8, 1], strides = [1, 1]} : vector<8x4xf32> to vector<8x1xf32>
    %5 = vector.broadcast %4 : vector<8x1xf32> to vector<8x32xf32>
    %6 = vector.broadcast %2 : vector<1x32xf32> to vector<8x32xf32>
    %7 = arith.mulf %5, %6 : vector<8x32xf32>
    %8 = vector.broadcast %3 : vector<1x32xf32> to vector<8x32xf32>
    %9 = arith.addf %7, %8 : vector<8x32xf32>
    %10 = math.sin %9 : vector<8x32xf32>
    %11 = vector.extract_strided_slice %1 {offsets = [0, 1], sizes = [8, 1], strides = [1, 1]} : vector<8x4xf32> to vector<8x1xf32>
    %12 = vector.broadcast %11 : vector<8x1xf32> to vector<8x32xf32>
    %13 = vector.broadcast %2 : vector<1x32xf32> to vector<8x32xf32>
    %14 = arith.mulf %12, %13 : vector<8x32xf32>
    %15 = vector.broadcast %3 : vector<1x32xf32> to vector<8x32xf32>
    %16 = arith.addf %14, %15 : vector<8x32xf32>
    %17 = math.sin %16 : vector<8x32xf32>
    %18 = arith.addf %10, %17 : vector<8x32xf32>
    %19 = vector.extract_strided_slice %1 {offsets = [0, 2], sizes = [8, 1], strides = [1, 1]} : vector<8x4xf32> to vector<8x1xf32>
    %20 = vector.broadcast %19 : vector<8x1xf32> to vector<8x32xf32>
    %21 = vector.broadcast %2 : vector<1x32xf32> to vector<8x32xf32>
    %22 = arith.mulf %20, %21 : vector<8x32xf32>
    %23 = vector.broadcast %3 : vector<1x32xf32> to vector<8x32xf32>
    %24 = arith.addf %22, %23 : vector<8x32xf32>
    %25 = math.sin %24 : vector<8x32xf32>
    %26 = arith.addf %18, %25 : vector<8x32xf32>
    %27 = vector.extract_strided_slice %1 {offsets = [0, 3], sizes = [8, 1], strides = [1, 1]} : vector<8x4xf32> to vector<8x1xf32>
    %28 = vector.broadcast %27 : vector<8x1xf32> to vector<8x32xf32>
    %29 = vector.broadcast %2 : vector<1x32xf32> to vector<8x32xf32>
    %30 = arith.mulf %28, %29 : vector<8x32xf32>
    %31 = vector.broadcast %3 : vector<1x32xf32> to vector<8x32xf32>
    %32 = arith.addf %30, %31 : vector<8x32xf32>
    %33 = math.sin %32 : vector<8x32xf32>
    %34 = arith.addf %26, %33 : vector<8x32xf32>
    %c0_4 = arith.constant 0 : index
    %c0_5 = arith.constant 0 : index
    %35 = vector.load %arg3[%c0_4, %c0_5] : memref<8x32xf32, #tpu.memory_space<vmem>>, vector<8x32xf32>
    tpu.vector_store %arg3[%c0_4, %c0_5], %34 {strides = array<i32>} : memref<8x32xf32, #tpu.memory_space<vmem>>, vector<8x32xf32>,
    return
  }
  func.func @transform_0(%arg0: i32) -> (i32, i32) {
    %c0_i32 = arith.constant 0 : i32
    %c0_i32_0 = arith.constant 0 : i32
    return %arg0, %c0_i32 : i32, i32
  }
  func.func @transform_1(%arg0: i32) -> (i32, i32) {
    %c0_i32 = arith.constant 0 : i32
    %c0_i32_0 = arith.constant 0 : i32
    %c0_i32_1 = arith.constant 0 : i32
    return %c0_i32, %c0_i32_0 : i32, i32
  }
  func.func @transform_2(%arg0: i32) -> (i32, i32) {
    %c0_i32 = arith.constant 0 : i32
    %c0_i32_0 = arith.constant 0 : i32
    return %arg0, %c0_i32 : i32, i32
  }
}

</mosaic_0001>

<bundles_post_ra>
// kernel: tile.6
= control target key start
LH: loop header
LB: loop body
LE: loop exit
PB: predicated region body
PF: predicated region fallthrough
CT: control target
= control target key end

     0   :  { %s28_s0 = inlined_call_operand.vmem [shape: f32[2], index: 0, kind: input, shape index: {}]   ;;  %s29_s1 = inlined_call_operand.vmem [shape: f32[16,2], index: 1, kind: output, shape index: {}]  }
   0x1   :  { %v4_v0 = vld [vmem:[%s28_s0] ss:$0 sm:$0xff] }
   0x2   :  { %5 = vst [vmem:[%s29_s1] sm:$0xff] %v4_v0  ;;  %8 = vst [vmem:[%s29_s1 + $0x8] sm:$0xff] %v4_v0 }

// kernel: temporal_embedding.1
= control target key start
LH: loop header
LB: loop body
LE: loop exit
PB: predicated region body
PF: predicated region fallthrough
CT: control target
= control target key end

     0   :  { %7 = vsyncpa [#allocation3], 0  ;;  %s1258_s0 = inlined_call_operand.vmem [shape: s32[16,4], index: 0, kind: input, shape index: {}]   ;;  %s1259_s1 = inlined_call_operand.vmem [shape: f32[2,32], index: 1, kind: input, shape index: {}]   ;;  %s1260_s2 = inlined_call_operand.hbm [shape: f32[16,32], index: 2, kind: output, shape index: {}]  }
   0x1   :  { %9 = vsyncpa [#allocation3 + $0x1], 0  ;;  %s874_s9 = smov 0   ;;  %s876_s10 = smov 0  }
   0x2   :  { %s878_s11 = smov 0   ;;  %s880_s12 = smov 0  }
   0x3 LB: > { %s895_s13 = sadd.s32 4294967295, %s846_s12   ;;  %s670_s14 = sadd.s32 4294967294, %s846_s12   ;;  %s846_s12 = sphi %s880_s12, %s1274_s12   ;;  %s842_s11 = sphi %s878_s11, %s1273_s11   ;;  %s838_s10 = sphi %s876_s10, %s1272_s10   ;;  %s834_s9 = sphi %s874_s9, %s1271_s9  }
   0x4   : > { %s899_s15 = sadd.s32 1, %s846_s12   ;;  %s69_s16 = sadd.s32 1, %s842_s11 }
   0x5   : > { %s66_s17 = ssub.s32 %s846_s12, %s899_s15  ;;  %p79_p0 = scmp.ne.s32.totalorder %s842_s11, %s838_s10 }
   0x6   : > { %p67_p1 = scmp.eq.s32.totalorder %s66_s17, 0  ;;  %p80_p2 = scmp.eq.s32.totalorder %s895_s13, 1 }
   0x7   : > { %p85_p3 = scmp.ne.s32.totalorder %s838_s10, %s834_s9  ;;  %p86_p4 = scmp.eq.s32.totalorder %s670_s14, 1 }
   0x8   : > { %s910_s18 = scalar_select %p67_p1, %s842_s11, %s69_s16  }
   0x9   : > { %p912_p5 = por %p80_p2, %p79_p0  ;;  %p916_p6 = por %p86_p4, %p85_p3 }
   0xa   : > { %p673_p7 = scmp.ge.s32.totalorder %s846_s12, 1  ;;  %p114_p8 = scmp.lt.s32.totalorder %s846_s12, 3 }
   0xc   : > { %p115_p9 = pnand %p673_p7, %p114_p8 }
   0xd   : > { %p135_p10 = scmp.lt.s32.totalorder (!%p115_p9), %s895_s13, 1  ;;  %v848_v0 = vmov (!%p115_p9), 2   ;;  %v849_v1 = vmov (!%p115_p9), 0   ;;  %v850_v4 = vmov (!%p115_p9), 3   ;;  %v851_v5 = vmov (!%p115_p9), 1   ;;  %s132_s30 = sand.u32 (!%p115_p9), 1, %s838_s10  }
   0xe   : > { %118 = sbr.rel (%p115_p9) target bundleno = 302 (0x12e), region = 28  ;;  %765 = vset.pattern.permute.xlu1 (!%p115_p9), %v848_v0  ;;  %763 = vset.pattern.permute.xlu0 (!%p115_p9), %v849_v1  ;;  %v930_v6 = vld [vmem:[%s1259_s1] ss:$0 sm:$0xff] (!%p115_p9)  ;;  %v935_v7 = vld [vmem:[%s1259_s1 + $0x1] ss:$0 sm:$0xff] (!%p115_p9)  ;;  %s1201_s3 = sshll.u32 (!%p115_p9), %s132_s30, 3 }
   0xf   : > { %v852_v41 = vmov (!%p115_p9), 683565275   ;;  %v853_v43 = vmov (!%p115_p9), 2475754826   ;;  %v854_v45 = vmov (!%p115_p9), 2131351028  }
  0x10   : > { %v855_v47 = vmov (!%p115_p9), 2102212464   ;;  %v856_v49 = vmov (!%p115_p9), 920167782   ;;  %v857_v58 = vmov (!%p115_p9), 1326507024  }
  0x11   : > { %s695_s4 = sshll.u32 (!%p115_p9), %s895_s13, 7  ;;  %s134_s5 = scalar_lea.vmem (!%p115_p9), [#allocation2], %s1201_s3 }
  0x12   : > { %s611_s6 = sshll.u32 (!%p115_p9), %s134_s5, 4  ;;  %s1214_s14 = scalar_lea.hbm (!%p115_p9), %s1260_s2, %s695_s4  ;;  %s1216_s6 = int_to_ptr.vmem [resolvable:$true] %s611_s6 }
  0x13   : > { %s784_s16 = scalar_lea.vmem (!%p115_p9), %s1216_s6, 128  ;;  %s858_s17 = smov (!%p115_p9), [#allocation2]  }
  0x14   : > { %p785_p11 = scmp.ne.s32.totalorder (!%p115_p9), %s1216_s6, %s784_s16 }
  0x15   : > { %s136_s21 = scalar_select %p135_p10, %s895_s13, 1 }
  0x16   : > { %s598_s13 = scalar_lea.sflag [#allocation3], %s132_s30  ;;  %p786_p12 = pnand %p785_p11, %p912_p5 }
  0x17   : > { %s675_s22 = sshll.u32 %s136_s21, 3  ;;  %s788_s21 = sshll.u32 %s858_s17, 4  ;;  %s789_s21 = int_to_ptr.vmem [resolvable:$false] %s788_s21 }
  0x18   : > { %s138_s25 = scalar_lea.vmem %s1258_s0, %s675_s22  ;;  %p787_p13 = pneg %p786_p12 }
  0x19   : > { %v139_v2 = vld [vmem:[%s138_s25] sm:$0xff]  ;;  %s790_s22 = scalar_lea.vmem %s789_s21, 256  ;;  %p791_p0 = scmp.lt.s32.totalorder %s1216_s6, %s789_s21 }
  0x1a   : > { %v140_v3 = vcvt.s32.f32 %v139_v2  ;;  %p792_p1 = scmp.lt.s32.totalorder %s790_s22, %s784_s16 }
  0x1c   : > { %374 = vperm.xlu1 %765, %v140_v3   ;;  %145 = vperm.xlu0 %763, %v140_v3   ;;  %p793_p2 = por %p792_p1, %p791_p0 }
  0x1e   : > { %p794_p3 = pnand %p793_p2, %p787_p13 }
  0x20   : > { %766 = vset.pattern.permute.xlu1 %v850_v4  ;;  %764 = vset.pattern.permute.xlu0 %v851_v5 }
  0x21   : > { %485 = vperm.xlu1 %766, %v140_v3   ;;  %263 = vperm.xlu0 %764, %v140_v3  }
  0x25   : > { %767 = vset.pattern.permute.xlu0 %v850_v4 }
  0x9b   : > { %v375_v8 = vpop.permute.xlu1 %374  ;;  %v146_v9 = vpop.permute.xlu0 %145 }
  0x9c   : > { %v377_v10 = vmul.f32 %v930_v6, %v375_v8  ;;  %v152_v11 = vmul.f32 %v930_v6, %v146_v9 }
  0x9e   : > { %v940_v12 = vadd.f32 %v935_v7, %v377_v10  ;;  %v943_v13 = vadd.f32 %v935_v7, %v152_v11 }
  0xa0   : > { %v379_v14 = vand.u32 2147483647, %v940_v12  ;;  %v382_v15 = vand.u32 2139095040, %v940_v12  ;;  %v158_v16 = vand.u32 2147483647, %v943_v13  ;;  %v486_v17 = vpop.permute.xlu1 %485  ;;  %v161_v18 = vand.u32 2139095040, %v943_v13 }
  0xa1   : > { %v488_v19 = vmul.f32 %v930_v6, %v486_v17 }
  0xa2   : > { %v383_v20 = vshrl.u32 %v382_v15, 23  ;;  %v386_v21 = vand.u32 8388607, %v379_v14  ;;  %v162_v22 = vshrl.u32 %v161_v18, 23  ;;  %v165_v23 = vand.u32 8388607, %v158_v16 }
  0xa3   : > { %v955_v24 = vadd.f32 %v935_v7, %v488_v19 }
  0xa4   : > { %v686_v25 = vadd.s32 4294967169, %v383_v20  ;;  %v678_v26 = vadd.s32 4294967169, %v162_v22  ;;  %v387_v29 = vor.u32 8388608, %v386_v21  ;;  %v166_v30 = vor.u32 8388608, %v165_v23 }
  0xa5   : > { %v493_v28 = vand.u32 2139095040, %v955_v24 }
  0xa6   : > { %v389_v27 = vadd.s32 1, %v686_v25  ;;  %v168_v31 = vadd.s32 1, %v678_v26  ;;  %v958_v37 = vshll.u32 %v387_v29, 8  ;;  %v960_v39 = vshll.u32 %v166_v30, 8 }
  0xa7   : > { %v494_v33 = vshrl.u32 %v493_v28, 23 }
  0xa8   : > { %vm390_vm0 = vcmp.gt.s32.totalorder %v389_v27, 0  ;;  %vm169_vm1 = vcmp.gt.s32.totalorder %v168_v31, 0 }
  0xa9   : > { %v391_v32 = vsel %vm390_vm0, %v389_v27, 0  ;;  %v170_v35 = vsel %vm169_vm1, %v168_v31, 0  ;;  %v969_v52 = vadd.s32 4294967169, %v494_v33 }
  0xaa   : > { %v393_v34 = vand.u32 31, %v391_v32  ;;  %v392_v36 = vshrl.u32 %v391_v32, 5  ;;  %v172_v38 = vand.u32 31, %v170_v35  ;;  %v967_v51 = vshrl.u32 %v170_v35, 5 }
  0xac   : > { %v394_v40 = vsub.s32 32, %v393_v34  ;;  %v396_v42 = vshll.u32 %v852_v41, %v393_v34  ;;  %v399_v44 = vshll.u32 %v853_v43, %v393_v34  ;;  %v402_v46 = vshll.u32 %v854_v45, %v393_v34 }
  0xad   : > { %v405_v48 = vshll.u32 %v855_v47, %v393_v34  ;;  %v408_v50 = vshll.u32 %v856_v49, %v393_v34  ;;  %vm411_vm2 = vcmp.lt.s32.totalorder %v392_v36, 1  ;;  %vm412_vm3 = vcmp.lt.s32.totalorder %v392_v36, 2 }
  0xae   : > { %v395_v53 = vshrl.u32 %v852_v41, %v394_v40  ;;  %v397_v54 = vshrl.u32 %v853_v43, %v394_v40  ;;  %v400_v55 = vshrl.u32 %v854_v45, %v394_v40  ;;  %v403_v56 = vshrl.u32 %v855_v47, %v394_v40 }
  0xaf   : > { %v406_v57 = vshrl.u32 %v856_v49, %v394_v40  ;;  %v409_v59 = vshrl.u32 %v857_v58, %v394_v40  ;;  %v173_v63 = vsub.s32 32, %v172_v38  ;;  %vm413_vm4 = vcmp.lt.s32.totalorder %v392_v36, 3 }
  0xb0   : > { %v398_v60 = vor.u32 %v397_v54, %v396_v42  ;;  %v401_v61 = vor.u32 %v400_v55, %v399_v44  ;;  %v404_v62 = vor.u32 %v403_v56, %v402_v46  ;;  %vm414_vm5 = vcmp.lt.s32.totalorder %v392_v36, 4  ;;  %v264_v56 = vpop.permute.xlu0 %263 }
  0xb1   : > { %v407_v0 = vor.u32 %v406_v57, %v405_v48  ;;  %v410_v1 = vor.u32 %v409_v59, %v408_v50  ;;  %v175_v11 = vshll.u32 %v852_v41, %v172_v38  ;;  %v176_v18 = vshrl.u32 %v853_v43, %v173_v63 }
  0xb2   : > { %v415_v2 = vsel %vm411_vm2, %v395_v53, %v398_v60  ;;  %v416_v3 = vsel %vm414_vm5, %v404_v62, 2102212464  ;;  %v419_v4 = vsel %vm411_vm2, %v398_v60, %v401_v61  ;;  %v423_v5 = vsel %vm411_vm2, %v401_v61, %v404_v62 }
  0xb3   : > { %v417_v8 = vsel %vm413_vm4, %v401_v61, %v416_v3  ;;  %v420_v9 = vsel %vm414_vm5, %v407_v0, 920167782  ;;  %v424_v10 = vsel %vm414_vm5, %v410_v1, 1326507024  ;;  %v178_v19 = vshll.u32 %v853_v43, %v172_v38 }
  0xb4   : > { %v421_v15 = vsel %vm413_vm4, %v404_v62, %v420_v9  ;;  %v425_v17 = vsel %vm413_vm4, %v407_v0, %v424_v10  ;;  %v418_v20 = vsel %vm412_vm3, %v415_v2, %v417_v8  ;;  %v179_v23 = vshrl.u32 %v854_v45, %v173_v63 }
  0xb5   : > { %v422_v21 = vsel %vm412_vm3, %v419_v4, %v421_v15  ;;  %v426_v22 = vsel %vm412_vm3, %v423_v5, %v425_v17  ;;  %v177_v29 = vor.u32 %v176_v18, %v175_v11  ;;  %v181_v31 = vshll.u32 %v854_v45, %v172_v38 }
  0xb6   : > { %v985_v25 = vmul.u32.u64.low %v958_v37, %v426_v22  ;;  %v986_v26 = vmul.u32.u64.high %v958_v37, %v426_v22, %v985_v25  ;;  %v989_v27 = vmul.u32.u64.low %v958_v37, %v422_v21  ;;  %v990_v28 = vmul.u32.u64.high %v958_v37, %v422_v21, %v989_v27 }
  0xb7   : > { %v180_v30 = vor.u32 %v179_v23, %v178_v19  ;;  %v182_v32 = vshrl.u32 %v855_v47, %v173_v63  ;;  %v174_v33 = vshrl.u32 %v852_v41, %v173_v63  ;;  %v184_v34 = vshll.u32 %v855_v47, %v172_v38 }
  0xb8   : > { %v185_v35 = vshrl.u32 %v856_v49, %v173_v63  ;;  %v188_v36 = vshrl.u32 %v857_v58, %v173_v63  ;;  %v434_v40 = vmul.u32 %v958_v37, %v418_v20  ;;  %v187_v44 = vshll.u32 %v856_v49, %v172_v38 }
  0xb9   : > { %v183_v42 = vor.u32 %v182_v32, %v181_v31  ;;  %vm190_vm6 = vcmp.lt.s32.totalorder %v967_v51, 1  ;;  %vm436_vm7 = vc.u32 %v986_v26, %v989_v27  ;;  %v437_v46 = vadd.s32 1, %v990_v28 }
  0xba   : > { %v186_v48 = vor.u32 %v185_v35, %v184_v34  ;;  %vm191_vm8 = vcmp.lt.s32.totalorder %v967_v51, 2  ;;  %v189_v50 = vor.u32 %v188_v36, %v187_v44  ;;  %vm192_vm9 = vcmp.lt.s32.totalorder %v967_v51, 3 }
  0xbb   : > { %vm193_vm10 = vcmp.lt.s32.totalorder %v967_v51, 4  ;;  %v198_v53 = vsel %vm190_vm6, %v177_v29, %v180_v30  ;;  %v438_v37 = vsel %vm436_vm7, %v437_v46, %v990_v28  ;;  %v202_v55 = vsel %vm190_vm6, %v180_v30, %v183_v42 }
  0xbc   : > { %v195_v54 = vsel %vm193_vm10, %v183_v42, 2102212464  ;;  %v199_v38 = vsel %vm193_vm10, %v186_v48, 920167782  ;;  %v439_v57 = vadd.s32 %v438_v37, %v434_v40  ;;  %v194_v59 = vsel %vm190_vm6, %v174_v33, %v177_v29 }
  0xbd   : > { %v200_v60 = vsel %vm192_vm9, %v183_v42, %v199_v38  ;;  %v203_v61 = vsel %vm193_vm10, %v189_v50, 1326507024  ;;  %v196_v62 = vsel %vm192_vm9, %v180_v30, %v195_v54  ;;  %v500_v1 = vadd.s32 1, %v969_v52 }
  0xbe   : > { %v201_v63 = vsel %vm191_vm8, %v198_v53, %v200_v60  ;;  %v204_v0 = vsel %vm192_vm9, %v186_v48, %v203_v61  ;;  %v266_v5 = vmul.f32 %v930_v6, %v264_v56  ;;  %v440_v10 = vadd.s32 536870912, %v439_v57 }
  0xbf   : > { %v205_v2 = vsel %vm191_vm8, %v202_v55, %v204_v0  ;;  %v1015_v3 = vmul.u32.u64.low %v960_v39, %v201_v63  ;;  %v1016_v4 = vmul.u32.u64.high %v960_v39, %v201_v63, %v1015_v3  ;;  %vm501_vm11 = vcmp.gt.s32.totalorder %v500_v1, 0 }
  0xc0   : > { %v1021_v8 = vmul.u32.u64.low %v960_v39, %v205_v2  ;;  %v1022_v9 = vmul.u32.u64.high %v960_v39, %v205_v2, %v1021_v8  ;;  %v197_v11 = vsel %vm191_vm8, %v194_v59, %v196_v62  ;;  %v502_v52 = vsel %vm501_vm11, %v500_v1, 0 }
  0xc1   : > { %v504_v15 = vand.u32 31, %v502_v52  ;;  %v216_v17 = vadd.s32 1, %v1016_v4  ;;  %v1028_v18 = vadd.f32 %v935_v7, %v266_v5  ;;  %v213_v19 = vmul.u32 %v960_v39, %v197_v11 }
  0xc2   : > { %vm215_vm12 = vc.u32 %v1022_v9, %v1015_v3  ;;  %v490_v6 = vand.u32 2147483647, %v955_v24  ;;  %v1034_v21 = vshrl.u32 %v440_v10, 30  ;;  %v503_v35 = vshrl.u32 %v502_v52, 5 }
  0xc3   : > { %v505_v20 = vsub.s32 32, %v504_v15  ;;  %v217_v51 = vsel %vm215_vm12, %v216_v17, %v1016_v4  ;;  %v507_v22 = vshll.u32 %v852_v41, %v504_v15  ;;  %v510_v7 = vshll.u32 %v853_v43, %v504_v15 }
  0xc4   : > { %v218_v23 = vadd.s32 %v217_v51, %v213_v19  ;;  %v513_v39 = vshll.u32 %v854_v45, %v504_v15  ;;  %v271_v29 = vand.u32 2139095040, %v1028_v18  ;;  %v497_v31 = vand.u32 8388607, %v490_v6 }
  0xc5   : > { %v508_v25 = vshrl.u32 %v853_v43, %v505_v20  ;;  %v511_v28 = vshrl.u32 %v854_v45, %v505_v20  ;;  %v514_v32 = vshrl.u32 %v855_v47, %v505_v20  ;;  %v516_v33 = vshll.u32 %v855_v47, %v504_v15 }
  0xc6   : > { %v219_v30 = vadd.s32 536870912, %v218_v23  ;;  %v442_v34 = vshll.u32 %v1034_v21, 30  ;;  %v517_v40 = vshrl.u32 %v856_v49, %v505_v20  ;;  %v519_v46 = vshll.u32 %v856_v49, %v504_v15 }
  0xc7   : > { %v509_v36 = vor.u32 %v508_v25, %v507_v22  ;;  %v512_v44 = vor.u32 %v511_v28, %v510_v7  ;;  %v520_v48 = vshrl.u32 %v857_v58, %v505_v20  ;;  %v515_v50 = vor.u32 %v514_v32, %v513_v39 }
  0xc8   : > { %v1049_v42 = vshrl.u32 %v219_v30, 30  ;;  %v518_v53 = vor.u32 %v517_v40, %v516_v33  ;;  %v272_v37 = vshrl.u32 %v271_v29, 23  ;;  %v1054_v38 = vsub.s32 %v439_v57, %v442_v34 }
  0xc9   : > { %v498_v55 = vor.u32 8388608, %v497_v31  ;;  %vm522_vm13 = vcmp.lt.s32.totalorder %v503_v35, 1  ;;  %vm525_vm14 = vcmp.lt.s32.totalorder %v503_v35, 4  ;;  %v521_v56 = vor.u32 %v520_v48, %v519_v46 }
  0xca   : > { %v221_v54 = vshll.u32 %v1049_v42, 30  ;;  %vm524_vm15 = vcmp.lt.s32.totalorder %v503_v35, 3  ;;  %v530_v59 = vsel %vm522_vm13, %v509_v36, %v512_v44  ;;  %v531_v60 = vsel %vm525_vm14, %v518_v53, 920167782 }
  0xcb   : > { %v506_v61 = vshrl.u32 %v852_v41, %v505_v20  ;;  %v532_v62 = vsel %vm524_vm15, %v515_v50, %v531_v60  ;;  %v682_v63 = vadd.s32 4294967169, %v272_v37  ;;  %vm523_vm0 = vcmp.lt.s32.totalorder %v503_v35, 2 }
  0xcc   : > { %v1059_v0 = vsub.s32 %v218_v23, %v221_v54  ;;  %v527_v1 = vsel %vm525_vm14, %v515_v50, 2102212464  ;;  %v533_v2 = vsel %vm523_vm0, %v530_v59, %v532_v62  ;;  %v534_v57 = vsel %vm522_vm13, %v512_v44, %v515_v50 }
  0xcd   : > { %v445_v4 = vsub.s32 0, %v1054_v38  ;;  %v535_v5 = vsel %vm525_vm14, %v521_v56, 1326507024  ;;  %v538_v8 = vshll.u32 %v498_v55, 8  ;;  %v526_v10 = vsel %vm522_vm13, %v506_v61, %v509_v36 }
  0xce   : > { %v528_v11 = vsel %vm524_vm15, %v512_v44, %v527_v1  ;;  %v536_v52 = vsel %vm524_vm15, %v518_v53, %v535_v5  ;;  %v278_v15 = vadd.s32 1, %v682_v63  ;;  %v224_v17 = vsub.s32 0, %v1059_v0 }
  0xcf   : > { %v537_v19 = vsel %vm523_vm0, %v534_v57, %v536_v52  ;;  %v1067_v20 = vmul.u32.u64.low %v538_v8, %v533_v2  ;;  %v1068_v51 = vmul.u32.u64.high %v538_v8, %v533_v2, %v1067_v20  ;;  %v529_v25 = vsel %vm523_vm0, %v526_v10, %v528_v11 }
  0xd0   : > { %v1071_v22 = vmul.u32.u64.low %v538_v8, %v537_v19  ;;  %v1072_v23 = vmul.u32.u64.high %v538_v8, %v537_v19, %v1071_v22  ;;  %vm279_vm1 = vcmp.gt.s32.totalorder %v278_v15, 0  ;;  %v687_v28 = vmin.u32 %v445_v4, %v1054_v38 }
  0xd1   : > { %v280_v7 = vsel %vm279_vm1, %v278_v15, 0  ;;  %v679_v39 = vmin.u32 %v224_v17, %v1059_v0  ;;  %v548_v29 = vadd.s32 1, %v1068_v51  ;;  %v545_v31 = vmul.u32 %v538_v8, %v529_v25 }
  0xd2   : > { %v282_v30 = vand.u32 31, %v280_v7  ;;  %vm547_vm2 = vc.u32 %v1072_v23, %v1067_v20  ;;  %v268_v32 = vand.u32 2147483647, %v1028_v18  ;;  %v447_v36 = vclz %v687_v28 }
  0xd3   : > { %v549_v33 = vsel %vm547_vm2, %v548_v29, %v1068_v51  ;;  %v226_v40 = vclz %v679_v39  ;;  %v281_v62 = vshrl.u32 %v280_v7, 5  ;;  %vm160_vm12 = vcmp.lt.s32.totalorder %v943_v13, 0 }
  0xd4   : > { %v550_v34 = vadd.s32 %v549_v33, %v545_v31  ;;  %v283_v35 = vsub.s32 32, %v282_v30  ;;  %v275_v46 = vand.u32 8388607, %v268_v32  ;;  %v688_v54 = vadd.s32 4294967294, %v447_v36 }
  0xd5   : > { %v680_v55 = vadd.s32 4294967294, %v226_v40  ;;  %v285_v56 = vshll.u32 %v852_v41, %v282_v30  ;;  %v288_v59 = vshll.u32 %v853_v43, %v282_v30  ;;  %v291_v63 = vshll.u32 %v854_v45, %v282_v30 }
  0xd6   : > { %v551_v44 = vadd.s32 536870912, %v550_v34  ;;  %v286_v48 = vshrl.u32 %v853_v43, %v283_v35  ;;  %v289_v50 = vshrl.u32 %v854_v45, %v283_v35  ;;  %v292_v37 = vshrl.u32 %v855_v47, %v283_v35 }
  0xd7   : > { %v276_v61 = vor.u32 8388608, %v275_v46  ;;  %v294_v57 = vshll.u32 %v855_v47, %v282_v30  ;;  %v295_v4 = vshrl.u32 %v856_v49, %v283_v35  ;;  %v297_v10 = vshll.u32 %v856_v49, %v282_v30 }
  0xd8   : > { %v1085_v53 = vshrl.u32 %v551_v44, 30  ;;  %v287_v1 = vor.u32 %v286_v48, %v285_v56  ;;  %v290_v2 = vor.u32 %v289_v50, %v288_v59  ;;  %v293_v8 = vor.u32 %v292_v37, %v291_v63 }
  0xd9   : > { %v298_v11 = vshrl.u32 %v857_v58, %v283_v35  ;;  %vm689_vm3 = vcmp.lt.s32.totalorder %v688_v54, 0  ;;  %vm681_vm4 = vcmp.lt.s32.totalorder %v680_v55, 0  ;;  %v284_v43 = vshrl.u32 %v852_v41, %v283_v35 }
  0xda   : > { %v553_v60 = vshll.u32 %v1085_v53, 30  ;;  %v296_v52 = vor.u32 %v295_v4, %v294_v57  ;;  %vm300_vm5 = vcmp.lt.s32.totalorder %v281_v62, 1  ;;  %vm303_vm6 = vcmp.lt.s32.totalorder %v281_v62, 4 }
  0xdb   : > { %v299_v15 = vor.u32 %v298_v11, %v297_v10  ;;  %vm301_vm7 = vcmp.lt.s32.totalorder %v281_v62, 2  ;;  %vm302_vm8 = vcmp.lt.s32.totalorder %v281_v62, 3  ;;  %v308_v47 = vsel %vm300_vm5, %v287_v1, %v290_v2 }
  0xdc   : > { %v1094_v5 = vsub.s32 %v550_v34, %v553_v60  ;;  %v309_v17 = vsel %vm303_vm6, %v296_v52, 920167782  ;;  %v305_v49 = vsel %vm303_vm6, %v293_v8, 2102212464  ;;  %v312_v58 = vsel %vm300_vm5, %v290_v2, %v293_v8 }
  0xdd   : > { %v310_v51 = vsel %vm302_vm8, %v293_v8, %v309_v17  ;;  %v229_v22 = vsel %vm681_vm4, 0, %v680_v55  ;;  %v313_v25 = vsel %vm303_vm6, %v299_v15, 1326507024  ;;  %v316_v7 = vshll.u32 %v276_v61, 8 }
  0xde   : > { %v556_v45 = vsub.s32 0, %v1094_v5  ;;  %v311_v41 = vsel %vm301_vm7, %v308_v47, %v310_v51  ;;  %v450_v28 = vsel %vm689_vm3, 0, %v688_v54  ;;  %v304_v29 = vsel %vm300_vm5, %v284_v43, %v287_v1 }
  0xdf   : > { %v314_v30 = vsel %vm302_vm8, %v296_v52, %v313_v25  ;;  %v306_v31 = vsel %vm302_vm8, %v290_v2, %v305_v49  ;;  %v1107_v34 = vmul.u32.u64.low %v316_v7, %v311_v41  ;;  %v1108_v35 = vmul.u32.u64.high %v316_v7, %v311_v41, %v1107_v34 }
  0xe0   : > { %v691_v19 = vmin.u32 %v556_v45, %v1094_v5  ;;  %v315_v33 = vsel %vm301_vm7, %v312_v58, %v314_v30  ;;  %v234_v36 = vsub.s32 4294967266, %v229_v22  ;;  %v307_v48 = vsel %vm301_vm7, %v304_v29, %v306_v31 }
  0xe1   : > { %v1110_v44 = vmul.u32.u64.low %v316_v7, %v315_v33  ;;  %v1111_v46 = vmul.u32.u64.high %v316_v7, %v315_v33, %v1110_v44  ;;  %v455_v50 = vsub.s32 4294967266, %v450_v28  ;;  %v326_v54 = vadd.s32 1, %v1108_v35 }
  0xe2   : > { %v558_v39 = vclz %v691_v19  ;;  %v235_v55 = vadd.s32 127, %v234_v36  ;;  %v323_v59 = vmul.u32 %v316_v7, %v307_v48  ;;  %v230_v60 = vsub.s32 32, %v229_v22 }
  0xe3   : > { %vm325_vm10 = vc.u32 %v1111_v46, %v1107_v34  ;;  %v456_v63 = vadd.s32 127, %v455_v50  ;;  %v214_v2 = vadd.s32 %v1015_v3, %v1022_v9  ;;  %v451_v62 = vsub.s32 32, %v450_v28 }
  0xe4   : > { %v692_v40 = vadd.s32 4294967294, %v558_v39  ;;  %v327_v61 = vsel %vm325_vm10, %v326_v54, %v1108_v35  ;;  %v236_v57 = vshll.u32 %v235_v55, 23  ;;  %v435_v11 = vadd.s32 %v989_v27, %v986_v26 }
  0xe5   : > { %v328_v1 = vadd.s32 %v327_v61, %v323_v59  ;;  %v232_v10 = vshrl.u32 %v214_v2, %v230_v60  ;;  %v457_v43 = vshll.u32 %v456_v63, 23  ;;  %v231_v15 = vshll.u32 %v1059_v0, %v229_v22 }
  0xe6   : > { %vm693_vm9 = vcmp.lt.s32.totalorder %v692_v40, 0  ;;  %v237_v47 = vor.u32 4788187, %v236_v57  ;;  %v453_v17 = vshrl.u32 %v435_v11, %v451_v62  ;;  %v546_v19 = vadd.s32 %v1067_v20, %v1072_v23 }
  0xe7   : > { %v561_v37 = vsel %vm693_vm9, 0, %v692_v40  ;;  %v329_v8 = vadd.s32 536870912, %v328_v1  ;;  %v233_v49 = vor.u32 %v232_v10, %v231_v15  ;;  %v452_v51 = vshll.u32 %v1054_v38, %v450_v28 }
  0xe8   : > { %v566_v56 = vsub.s32 4294967266, %v561_v37  ;;  %v562_v52 = vsub.s32 32, %v561_v37  ;;  %v458_v58 = vor.u32 4788187, %v457_v43  ;;  %v238_v27 = vand.u32 2147483647, %v237_v47 }
  0xe9   : > { %v1121_v45 = vshrl.u32 %v329_v8, 30  ;;  %v454_v25 = vor.u32 %v453_v17, %v452_v51  ;;  %v563_v7 = vshll.u32 %v1094_v5, %v561_v37  ;;  %v240_v22 = vcvt.s32.f32 %v233_v49 }
  0xea   : > { %v567_v4 = vadd.s32 127, %v566_v56  ;;  %v564_v41 = vshrl.u32 %v546_v19, %v562_v52  ;;  %v459_v29 = vand.u32 2147483647, %v458_v58  ;;  %v324_v50 = vadd.s32 %v1107_v34, %v1111_v46 }
  0xeb   : > { %v331_v9 = vshll.u32 %v1121_v45, 30  ;;  %v241_v20 = vmul.f32 %v240_v22, %v238_v27  ;;  %v461_v23 = vcvt.s32.f32 %v454_v25  ;;  %vm381_vm13 = vcmp.lt.s32.totalorder %v940_v12, 0 }
  0xec   : > { %v568_v3 = vshll.u32 %v567_v4, 23  ;;  %v565_v30 = vor.u32 %v564_v41, %v563_v7  ;;  %vm1138_vm14 = vcmp.le.f32.partialorder %v158_v16, 0.7853982  ;;  %v465_v2 = vsub.s32 4, %v1034_v21 }
  0xed   : > { %v332_v26 = vsub.s32 %v328_v1, %v331_v9  ;;  %v462_v36 = vmul.f32 %v461_v23, %v459_v29  ;;  %v242_v28 = vxor.u32 2147483648, %v241_v20  ;;  %vm492_vm15 = vcmp.lt.s32.totalorder %v955_v24, 0 }
  0xee   : > { %v569_v39 = vor.u32 4788187, %v568_v3  ;;  %v572_v40 = vcvt.s32.f32 %v565_v30  ;;  %vm1149_vm0 = vcmp.le.f32.partialorder %v379_v14, 0.7853982  ;;  %v244_v10 = vsub.s32 4, %v1049_v42 }
  0xef   : > { %v334_v0 = vsub.s32 0, %v332_v26  ;;  %v463_v5 = vxor.u32 2147483648, %v462_v36  ;;  %v243_v55 = vsel %vm160_vm12, %v242_v28, %v241_v20  ;;  %vm1161_vm1 = vcmp.le.f32.partialorder %v490_v6, 0.7853982 }
  0xf0   : > { %v570_v33 = vand.u32 2147483647, %v569_v39  ;;  %v246_v57 = vsel %vm1138_vm14, %v943_v13, %v243_v55  ;;  %v466_v52 = vsel %vm381_vm13, %v465_v2, %v1034_v21  ;;  %v576_v47 = vsub.s32 4, %v1085_v53 }
  0xf1   : > { %v683_v31 = vmin.u32 %v334_v0, %v332_v26  ;;  %v464_v63 = vsel %vm381_vm13, %v463_v5, %v462_v36  ;;  %768 = vcosq.f32 %v246_v57  ;;  %v354_v6 = vsub.s32 4, %v1121_v45 }
  0xf2   : > { %v573_v44 = vmul.f32 %v572_v40, %v570_v33  ;;  %v467_v8 = vsel %vm1149_vm0, %v940_v12, %v464_v63  ;;  %770 = vsinq.f32 %v246_v57  ;;  %v245_v19 = vsel %vm160_vm12, %v244_v10, %v1049_v42 }
  0xf3   : > { %v336_v35 = vclz %v683_v31  ;;  %772 = vsinq.f32 %v467_v8  ;;  %v468_v21 = vsel %vm1149_vm0, 0, %v466_v52  ;;  %vm1180_vm2 = vcmp.le.f32.partialorder %v268_v32, 0.7853982 }
  0xf4   : > { %v574_v56 = vxor.u32 2147483648, %v573_v44  ;;  %774 = vcosq.f32 %v467_v8  ;;  %vm270_vm3 = vcmp.lt.s32.totalorder %v1028_v18, 0  ;;  %v247_v49 = vsel %vm1138_vm14, 0, %v245_v19 }
  0xf5   : > { %v684_v38 = vadd.s32 4294967294, %v336_v35  ;;  %v577_v42 = vsel %vm492_vm15, %v576_v47, %v1085_v53  ;;  %v355_v58 = vsel %vm270_vm3, %v354_v6, %v1121_v45  ;;  %v472_v32 = vadd.s32 3, %v468_v21 }
  0xf6   : > { %v575_v16 = vsel %vm492_vm15, %v574_v56, %v573_v44  ;;  %v357_v27 = vsel %vm1180_vm2, 0, %v355_v58  ;;  %v579_v25 = vsel %vm1161_vm1, 0, %v577_v42  ;;  %vm250_vm15 = vweird.f32 %v943_v13 }
  0xf7   : > { %vm685_vm11 = vcmp.lt.s32.totalorder %v684_v38, 0  ;;  %v578_v15 = vsel %vm1161_vm1, %v955_v24, %v575_v16  ;;  %v361_v0 = vadd.s32 3, %v357_v27  ;;  %v583_v45 = vadd.s32 3, %v579_v25 }
  0xf8   : > { %v339_v48 = vsel %vm685_vm11, 0, %v684_v38  ;;  %776 = vcosq.f32 %v578_v15  ;;  %v473_v30 = vand.u32 3, %v472_v32  ;;  %vm360_vm0 = vweird.f32 %v1028_v18 }
  0xf9   : > { %v340_v37 = vsub.s32 32, %v339_v48  ;;  %v344_v54 = vsub.s32 4294967266, %v339_v48  ;;  %v341_v59 = vshll.u32 %v332_v26, %v339_v48  ;;  %778 = vsinq.f32 %v578_v15 }
  0xfa   : > { %v251_v26 = vadd.s32 3, %v247_v49  ;;  %v362_v36 = vand.u32 3, %v361_v0  ;;  %v584_v38 = vand.u32 3, %v583_v45  ;;  %vm475_vm7 = vcmp.eq.s32.totalorder %v473_v30, 0 }
  0xfb   : > { %v342_v60 = vshrl.u32 %v324_v50, %v340_v37  ;;  %v345_v61 = vadd.s32 127, %v344_v54  ;;  %v769_v7 = vpop.eup %768  ;;  %vm474_vm8 = vcmp.lt.s32.totalorder %v473_v30, 2  ;;  %vm478_vm9 = vcmp.eq.s32.totalorder %v473_v30, 2 }
  0xfc   : > { %v771_v53 = vpop.eup %770  ;;  %v252_v29 = vand.u32 3, %v251_v26  ;;  %v258_v23 = vxor.u32 2147483648, %v769_v7  ;;  %vm367_vm10 = vcmp.eq.s32.totalorder %v362_v36, 2  ;;  %vm586_vm11 = vcmp.eq.s32.totalorder %v584_v38, 0 }
  0xfd   : > { %v343_v34 = vor.u32 %v342_v60, %v341_v59  ;;  %v346_v46 = vshll.u32 %v345_v61, 23  ;;  %v773_v39 = vpop.eup %772  ;;  %v255_v20 = vxor.u32 2147483648, %v771_v53  ;;  %vm364_vm12 = vcmp.eq.s32.totalorder %v362_v36, 0 }
  0xfe   : > { %v775_v22 = vpop.eup %774  ;;  %v476_v35 = vxor.u32 2147483648, %v773_v39  ;;  %vm253_vm4 = vcmp.lt.s32.totalorder %v252_v29, 2  ;;  %vm254_vm5 = vcmp.eq.s32.totalorder %v252_v29, 0  ;;  %vm257_vm6 = vcmp.eq.s32.totalorder %v252_v29, 2 }
  0xff   : > { %v347_v4 = vor.u32 4788187, %v346_v46  ;;  %v350_v43 = vcvt.s32.f32 %v343_v34  ;;  %v479_v40 = vxor.u32 2147483648, %v775_v22  ;;  %v256_v44 = vsel %vm254_vm5, %v769_v7, %v255_v20 }
 0x100   : > { %v259_v48 = vsel %vm257_vm6, %v258_v23, %v771_v53  ;;  %v477_v55 = vsel %vm475_vm7, %v775_v22, %v476_v35  ;;  %vm589_vm13 = vcmp.eq.s32.totalorder %v584_v38, 2  ;;  %vm363_vm14 = vcmp.lt.s32.totalorder %v362_v36, 2 }
 0x101   : > { %v348_v14 = vand.u32 2147483647, %v347_v4  ;;  %v480_v59 = vsel %vm478_vm9, %v479_v40, %v773_v39  ;;  %v260_v60 = vsel %vm253_vm4, %v256_v44, %v259_v48  ;;  %vm585_vm1 = vcmp.lt.s32.totalorder %v584_v38, 2 }
 0x102   : > { %v777_v31 = vpop.eup %776  ;;  %v481_v2 = vsel %vm474_vm8, %v477_v55, %v480_v59  ;;  %v261_v57 = vsel %vm250_vm15, nan, %v260_v60  ;;  %vm595_vm4 = vcmask 261120  }
 0x103   : > { %v351_v17 = vmul.f32 %v350_v43, %v348_v14  ;;  %v779_v33 = vpop.eup %778  ;;  %v590_v50 = vxor.u32 2147483648, %v777_v31 }
 0x104   : > { %v587_v5 = vxor.u32 2147483648, %v779_v33 }
 0x105   : > { %v352_v3 = vxor.u32 2147483648, %v351_v17  ;;  %v591_v34 = vsel %vm589_vm13, %v590_v50, %v779_v33 }
 0x106   : > { %v588_v1 = vsel %vm586_vm11, %v777_v31, %v587_v5 }
 0x107   : > { %v353_v51 = vsel %vm270_vm3, %v352_v3, %v351_v17  ;;  %v592_v4 = vsel %vm585_vm1, %v588_v1, %v591_v34  ;;  %vm582_vm3 = vweird.f32 %v955_v24 }
 0x108   : > { %v356_v41 = vsel %vm1180_vm2, %v1028_v18, %v353_v51  ;;  %vm471_vm2 = vweird.f32 %v940_v12  ;;  %v593_v13 = vsel %vm582_vm3, nan, %v592_v4 }
 0x109   : > { %780 = vcosq.f32 %v356_v41  ;;  %v482_v8 = vsel %vm471_vm2, nan, %v481_v2 }
 0x10a   : > { %782 = vsinq.f32 %v356_v41 }
 0x113   : > { %v781_v28 = vpop.eup %780 }
 0x114   : > { %v783_v37 = vpop.eup %782  ;;  %v368_v54 = vxor.u32 2147483648, %v781_v28 }
 0x115   : > { %v365_v56 = vxor.u32 2147483648, %v783_v37 }
 0x116   : > { %v369_v61 = vsel %vm367_vm10, %v368_v54, %v783_v37 }
 0x117   : > { %v366_v63 = vsel %vm364_vm12, %v781_v28, %v365_v56 }
 0x118   : > { %v370_v46 = vsel %vm363_vm14, %v366_v63, %v369_v61 }
 0x119   : > { %v371_v62 = vsel %vm360_vm0, nan, %v370_v46 }
 0x11a   : > { %v372_v16 = vadd.f32 %v371_v62, %v261_v57 }
 0x11c   : > { %v483_v10 = vadd.f32 %v482_v8, %v372_v16 }
 0x11e   : > { %v594_v18 = vadd.f32 %v593_v13, %v483_v10 }
 0x120   : > { %596 = vst.msk [vmem:[%s134_s5] sm:$0xff] %vm595_vm4, %v594_v18 }
 0x121   : > { %797 = shalt.err (!%p794_p3)
}
 0x122   : > { %s798_s23 = scalar_lea.hbm %s1214_s14, 128  ;;  %s802_s26 = scalar_lea.hbm %s1260_s2, 256 }
 0x123   : > { %p799_p4 = scmp.ne.s32.totalorder %s1214_s14, %s798_s23  ;;  %p803_p9 = scmp.lt.u32.totalorder %s1214_s14, %s1260_s2 }
 0x124   : > { %p804_p10 = scmp.lt.u32.totalorder %s802_s26, %s798_s23  ;;  %p806_p12 = scmp.lt.u32.totalorder %s798_s23, %s1214_s14 }
 0x125   : > { %p800_p7 = pnand %p799_p4, %p912_p5 }
 0x126   : > { %p805_p11 = por %p804_p10, %p803_p9 }
 0x127   : > { %p801_p8 = pneg %p800_p7 }
 0x128   : > { %p807_p13 = por %p806_p12, %p805_p11 }
 0x12a   : > { %p808_p0 = pnand %p807_p13, %p801_p8 }
 0x12c   : > { %811 = shalt.err (!%p808_p0)
}
 0x12d   : > { %714 = dma.vmem_to_hbm [thread:$0]  (%p912_p5), %s1216_s6, 128, %s1214_s14, %s598_s13  }
 0x12e PF: > { %p720_p1 = scmp.ge.s32.totalorder %s846_s12, 2  ;;  %s623_s29 = sand.u32 1, %s834_s9  }
 0x12f   : > { %s624_s30 = scalar_lea.sflag [#allocation3], %s623_s29 }
 0x130   : > { %p717_p2 = pnand %p720_p1, %p916_p6 }
 0x132   : > { %829 = dma.done.wait (!%p717_p2), %s624_s30, 128  }
 0x133   : > { %831 = vsyncadd (!%p717_p2), %s624_s30, 4294967168  ;;  %p12_p3 = scmp.ge.s32.totalorder %s899_s15, 4   ;;  %s1271_s9 = smov %s838_s10 }
 0x134   : > { %s1272_s10 = smov %s842_s11  ;;  %s1273_s11 = smov %s910_s18 }
 0x135   : > { %s1274_s12 = smov %s899_s15  ;;  %14 = sbr.rel (!%p12_p3) target bundleno = 3 (0x3), region = 63 }
 0x13c   :  { %629 = vsyncpa [#allocation3], 1 }
 0x13d   :  { %631 = vsyncpa [#allocation3 + $0x1], 1 }

</bundles_post_ra>
